<compile_context>
chip_gen: v5e
topology: v5e:2x2
jax: 0.10.0
libtpu: 0.0.40
codegen_flags: <defaults>
</compile_context>

<pallas_src>
import functools
import math

import jax
import jax.numpy as jnp
from jax.experimental import pallas as pl
from jax.experimental.pallas import tpu as pltpu


def _round_up(x, m):
    return ((x + m - 1) // m) * m


def _vmem_capacity_bytes():
    """Physical VMEM per TensorCore; conservative 64 MiB (v7x) fallback."""
    try:
        cap = int(pltpu.get_tpu_info().vmem_capacity_bytes)
        if cap > 0:
            return cap
    except Exception:
        pass
    return 64 << 20


# ----------------------------------------------------------------------------
# Kernels.  All matmul inputs arrive pre-cast to the MXU dtype; accumulation and
# the bias/ReLU epilogue stay in f32 (v5e's VPU has no bf16).
# TODO(synk): torch.nn.Dropout is identity in eval mode; training-mode RNG masking
# is intentionally not implemented.
# ----------------------------------------------------------------------------
def _ffn_kernel_single(x_ref, w1_ref, b1_ref, w2_ref, b2_ref, o_ref):
    # Whole FF dimension in one step: no accumulator needed.
    h = jnp.dot(x_ref[...], w1_ref[...], preferred_element_type=jnp.float32)
    h = jnp.maximum(h + b1_ref[...].astype(jnp.float32), 0.0)
    out = jnp.dot(h.astype(w2_ref.dtype), w2_ref[...],
                  preferred_element_type=jnp.float32)
    o_ref[...] = (out + b2_ref[...].astype(jnp.float32)).astype(o_ref.dtype)


def _ffn_kernel_accum_out(x_ref, w1_ref, b1_ref, w2_ref, b2_ref, o_ref):
    # Multi-step FF reduction, f32 output: accumulate directly into the resident
    # output block (its BlockSpec index is constant across the FF axis).
    f = pl.program_id(1)

    @pl.when(f == 0)
    def _():
        o_ref[...] = jnp.broadcast_to(b2_ref[...].astype(o_ref.dtype), o_ref.shape)

    h = jnp.dot(x_ref[...], w1_ref[...], preferred_element_type=jnp.float32)
    h = jnp.maximum(h + b1_ref[...].astype(jnp.float32), 0.0)
    o_ref[...] += jnp.dot(h.astype(w2_ref.dtype), w2_ref[...],
                          preferred_element_type=jnp.float32)


def _ffn_kernel_accum_scratch(x_ref, w1_ref, b1_ref, w2_ref, b2_ref, o_ref, acc_ref):
    # Multi-step FF reduction, non-f32 output: f32 VMEM accumulator scratch.
    f = pl.program_id(1)

    @pl.when(f == 0)
    def _():
        acc_ref[...] = jnp.broadcast_to(b2_ref[...].astype(jnp.float32), acc_ref.shape)

    h = jnp.dot(x_ref[...], w1_ref[...], preferred_element_type=jnp.float32)
    h = jnp.maximum(h + b1_ref[...].astype(jnp.float32), 0.0)
    acc_ref[...] += jnp.dot(h.astype(w2_ref.dtype), w2_ref[...],
                            preferred_element_type=jnp.float32)

    @pl.when(f == pl.num_programs(1) - 1)
    def _():
        o_ref[...] = acc_ref[...].astype(o_ref.dtype)


# ----------------------------------------------------------------------------
# One-time weight preparation (hoist out of the hot path).
# ----------------------------------------------------------------------------
def prepare_ffn_params(w1, b1, w2, b2, *, mxu_dtype=jnp.bfloat16, align=256):
    """Transpose torch-layout weights to [in, out], pad to `align`, cast to mxu_dtype.

    w1: (dim_ff, dim_model), b1: (dim_ff,)
    w2: (dim_model, dim_ff), b2: (dim_model,)
    """
    FF, D = w1.shape
    assert w2.shape == (D, FF) and b1.shape == (FF,) and b2.shape == (D,)
    D_pad = _round_up(D, align)
    FF_pad = _round_up(FF, align)
    w1_t = jnp.pad(w1.T, ((0, D_pad - D), (0, FF_pad - FF))).astype(mxu_dtype)
    w2_t = jnp.pad(w2.T, ((0, FF_pad - FF), (0, D_pad - D))).astype(mxu_dtype)
    b1_2d = jnp.pad(b1.reshape(1, FF), ((0, 0), (0, FF_pad - FF))).astype(jnp.float32)
    b2_2d = jnp.pad(b2.reshape(1, D), ((0, 0), (0, D_pad - D))).astype(jnp.float32)
    return dict(w1_t=w1_t, b1=b1_2d, w2_t=w2_t, b2=b2_2d,
                D=D, FF=FF, D_pad=D_pad, FF_pad=FF_pad,
                mxu_dtype=jnp.dtype(mxu_dtype))


# ----------------------------------------------------------------------------
# Tile selection: biggest tm that fits the per-generation VMEM budget, tff in
# {512, 256} (256-aligned for the v6e/v7x MXU), >= 2 M tiles when M is large.
# ----------------------------------------------------------------------------
def _select_tiles(M, D_pad, FF_pad, mxu_bytes, out_bytes, out_accum,
                  budget, tm=None, tff=None):
    if tff is None:
        tff_cands = [512, 256] if FF_pad % 512 == 0 else [256]
        tff_cands = [t for t in tff_cands if FF_pad % t == 0] or [FF_pad]
    else:
        assert FF_pad % tff == 0 and tff % 128 == 0
        tff_cands = [tff]

    if tm is None:
        tm_upper = _round_up(M, 16)
        if M >= 512:
            # Keep >= 2 "parallel" M steps so v7x megacore can use both TensorCores.
            tm_upper = min(tm_upper, _round_up((M + 1) // 2, 16))
        base = [1024, 768, 512, 384, 256, 192, 128, 96, 64, 48, 32, 16]
        tm_cands = sorted({c for c in base if c <= tm_upper} | {tm_upper}, reverse=True)
    else:
        tm_cands = [_round_up(tm, 16)]

    def footprint(tm_c, tff_c):
        multi = (FF_pad // tff_c) > 1
        use_scratch = multi and not out_accum
        return (2 * 2 * D_pad * tff_c * mxu_bytes        # W1 + W2 tiles, double-buffered
                + 2 * (tff_c + D_pad) * 4                 # b1 + b2 tiles (f32)
                + 2 * tm_c * D_pad * mxu_bytes            # x tile, double-buffered
                + 2 * tm_c * D_pad * out_bytes            # out tile
                + (tm_c * D_pad * 4 if use_scratch else 0))

    for tm_c in tm_cands:
        for tff_c in tff_cands:
            fp = footprint(tm_c, tff_c)
            if fp <= budget:
                return tm_c, tff_c, fp
    tm_c, tff_c = tm_cands[-1], tff_cands[-1]
    return tm_c, tff_c, footprint(tm_c, tff_c)


# ----------------------------------------------------------------------------
# Forward pass with pre-prepared params.
# ----------------------------------------------------------------------------
def ffn_forward(x, params, *, tm=None, tff=None):
    B, S, D = x.shape
    assert D == params["D"]
    M = B * S
    D_pad, FF_pad = params["D_pad"], params["FF_pad"]
    mxu_dtype = params["mxu_dtype"]
    out_dtype = x.dtype
    mxu_bytes = jnp.dtype(mxu_dtype).itemsize
    out_bytes = jnp.dtype(out_dtype).itemsize
    out_accum = jnp.dtype(out_dtype) == jnp.dtype(jnp.float32)

    vmem_cap = _vmem_capacity_bytes()
    budget = max(vmem_cap - (8 << 20), 16 << 20)

    tm, tff, fp = _select_tiles(M, D_pad, FF_pad, mxu_bytes, out_bytes,
                                out_accum, budget, tm=tm, tff=tff)
    M_pad = _round_up(M, tm)
    n_m = M_pad // tm
    n_ff = FF_pad // tff

    # Activations: pad + cast at the HBM boundary.
    x2d = jnp.pad(x.reshape(M, D), ((0, M_pad - M), (0, D_pad - D))).astype(mxu_dtype)

    vmem_limit = int(min(budget, max(fp + (4 << 20), 32 << 20)))
    cost = pl.CostEstimate(
        flops=4 * M_pad * D_pad * FF_pad,
        transcendentals=0,
        bytes_accessed=(M_pad * D_pad * (mxu_bytes + out_bytes)
                        + n_m * 2 * D_pad * FF_pad * mxu_bytes
                        + n_m * (FF_pad + D_pad) * 4))

    if n_ff == 1:
        grid = (n_m,)
        in_specs = [
            pl.BlockSpec((tm, D_pad), lambda i: (i, 0)),     # x row-tile
            pl.BlockSpec((D_pad, tff), lambda i: (0, 0)),    # W1^T (whole)
            pl.BlockSpec((1, tff), lambda i: (0, 0)),        # b1
            pl.BlockSpec((tff, D_pad), lambda i: (0, 0)),    # W2^T (whole)
            pl.BlockSpec((1, D_pad), lambda i: (0, 0)),      # b2
        ]
        out_specs = pl.BlockSpec((tm, D_pad), lambda i: (i, 0))
        kernel = _ffn_kernel_single
        scratch = []
        dims = ("parallel",)
    else:
        grid = (n_m, n_ff)
        in_specs = [
            pl.BlockSpec((tm, D_pad), lambda i, f: (i, 0)),   # x row-tile
            pl.BlockSpec((D_pad, tff), lambda i, f: (0, f)),  # W1^T slice
            pl.BlockSpec((1, tff), lambda i, f: (0, f)),      # b1 slice
            pl.BlockSpec((tff, D_pad), lambda i, f: (f, 0)),  # W2^T slice
            pl.BlockSpec((1, D_pad), lambda i, f: (0, 0)),    # b2
        ]
        out_specs = pl.BlockSpec((tm, D_pad), lambda i, f: (i, 0))
        if out_accum:
            kernel = _ffn_kernel_accum_out
            scratch = []
        else:
            kernel = _ffn_kernel_accum_scratch
            scratch = [pltpu.VMEM((tm, D_pad), jnp.float32)]
        dims = ("parallel", "arbitrary")

    out2d = pl.pallas_call(
        kernel,
        out_shape=jax.ShapeDtypeStruct((M_pad, D_pad), out_dtype),
        grid_spec=pltpu.PrefetchScalarGridSpec(
            num_scalar_prefetch=0,
            grid=grid,
            in_specs=in_specs,
            out_specs=out_specs,
            scratch_shapes=scratch,
        ),
        compiler_params=pltpu.CompilerParams(
            dimension_semantics=dims,
            vmem_limit_bytes=vmem_limit,
        ),
        cost_estimate=cost,
    )(x2d, params["w1_t"], params["b1"], params["w2_t"], params["b2"])

    return out2d[:M, :D].reshape(B, S, D)


def feed_forward_layer(x, w1, b1, w2, b2, *, mxu_dtype=jnp.bfloat16, tm=None, tff=None):
    """Convenience one-shot path: prepares weights then runs the kernel.

    x : (batch, seq, dim_model)
    w1: (dim_ff, dim_model)  torch nn.Linear layout, b1: (dim_ff,)
    w2: (dim_model, dim_ff),                          b2: (dim_model,)
    """
    params = prepare_ffn_params(w1, b1, w2, b2, mxu_dtype=mxu_dtype)
    return ffn_forward(x, params, tm=tm, tff=tff)


if __name__ == "__main__":
    # Small deterministic example consistent with the module's forward:
    # x: (batch_size, seq_len, dim_model)
    batch, seq, dim_model, dim_ff = 2, 8, 32, 64

    key = jax.random.PRNGKey(0)
    kx, kw1, kb1, kw2, kb2 = jax.random.split(key, 5)

    x = jax.random.normal(kx, (batch, seq, dim_model), dtype=jnp.float32)
    # torch.nn.Linear weights: (out_features, in_features)
    w1 = jax.random.normal(kw1, (dim_ff, dim_model), dtype=jnp.float32) * 0.1
    b1 = jax.random.normal(kb1, (dim_ff,), dtype=jnp.float32) * 0.1
    w2 = jax.random.normal(kw2, (dim_model, dim_ff), dtype=jnp.float32) * 0.1
    b2 = jax.random.normal(kb2, (dim_model,), dtype=jnp.float32) * 0.1

    # --- f32 MXU path (tight check vs pure-JAX reference; dropout = identity) ---
    out_f32 = feed_forward_layer(x, w1, b1, w2, b2, mxu_dtype=jnp.float32)
    jax.block_until_ready(out_f32)
    ref = jnp.maximum(x @ w1.T + b1, 0.0) @ w2.T + b2
    assert out_f32.shape == (batch, seq, dim_model)
    assert jnp.allclose(out_f32, ref, atol=1e-4, rtol=1e-4)

    # --- default bf16-MXU path: weights prepared ONCE, reused across calls -------
    params = prepare_ffn_params(w1, b1, w2, b2, mxu_dtype=jnp.bfloat16)
    out_bf = ffn_forward(x, params)
    out_bf = ffn_forward(x, params)       # second call reuses prepared weights
    jax.block_until_ready(out_bf)
    f32, bf = jnp.float32, jnp.bfloat16
    h_ref = jnp.maximum(
        x.astype(bf).astype(f32) @ w1.T.astype(bf).astype(f32) + b1, 0.0)
    ref_bf = h_ref.astype(bf).astype(f32) @ w2.T.astype(bf).astype(f32) + b2
    assert out_bf.shape == (batch, seq, dim_model)
    assert jnp.allclose(out_bf, ref_bf, atol=2e-2, rtol=2e-2)

    print("KERNEL_OK")
</pallas_src>

<mosaic_0001>
module attributes {stable_mosaic.version = 11 : i64} {
  func.func @_ffn_kernel_single(%arg0: i32, %arg1: memref<16x256xf32, #tpu.memory_space<vmem>>, %arg2: memref<256x256xf32, #tpu.memory_space<vmem>>, %arg3: memref<1x256xf32, #tpu.memory_space<vmem>>, %arg4: memref<256x256xf32, #tpu.memory_space<vmem>>, %arg5: memref<1x256xf32, #tpu.memory_space<vmem>>, %arg6: memref<16x256xf32, #tpu.memory_space<vmem>>) attributes {dimension_semantics = [#tpu.dimension_semantics<parallel>], iteration_bounds = array<i64: 1>, scalar_prefetch = 0 : i64, scratch_operands = 0 : i64, tpu.core_type = #tpu.core_type<tc>, window_params = [{transform_indices = @transform_0, window_bounds = array<i64: 16, 256>}, {pipeline_mode = #tpu.pipeline_mode<synchronous>, transform_indices = @transform_1, window_bounds = array<i64: 256, 256>}, {pipeline_mode = #tpu.pipeline_mode<synchronous>, transform_indices = @transform_2, window_bounds = array<i64: 1, 256>}, {pipeline_mode = #tpu.pipeline_mode<synchronous>, transform_indices = @transform_3, window_bounds = array<i64: 256, 256>}, {pipeline_mode = #tpu.pipeline_mode<synchronous>, transform_indices = @transform_4, window_bounds = array<i64: 1, 256>}, {transform_indices = @transform_5, window_bounds = array<i64: 16, 256>}]} {
    %c0 = arith.constant 0 : index
    %c0_0 = arith.constant 0 : index
    %0 = vector.load %arg1[%c0, %c0_0] : memref<16x256xf32, #tpu.memory_space<vmem>>, vector<16x256xf32>
    %c0_1 = arith.constant 0 : index
    %c0_2 = arith.constant 0 : index
    %1 = vector.load %arg2[%c0_1, %c0_2] : memref<256x256xf32, #tpu.memory_space<vmem>>, vector<256x256xf32>
    %cst = arith.constant dense<0.000000e+00> : vector<16x256xf32>
    %2 = tpu.matmul %0, %1, %cst {dimension_numbers = #tpu.dot_dimension_numbers<[1], [0], [0], [1], [0, 0, 1, 1], [], []>} : vector<16x256xf32>, vector<256x256xf32>, vector<16x256xf32> -> vector<16x256xf32>
    %c0_3 = arith.constant 0 : index
    %c0_4 = arith.constant 0 : index
    %3 = vector.load %arg3[%c0_3, %c0_4] : memref<1x256xf32, #tpu.memory_space<vmem>>, vector<1x256xf32>
    %4 = vector.broadcast %3 : vector<1x256xf32> to vector<16x256xf32>
    %5 = arith.addf %2, %4 : vector<16x256xf32>
    %cst_5 = arith.constant 0.000000e+00 : f32
    %6 = vector.broadcast %cst_5 : f32 to vector<16x256xf32>
    %7 = arith.maximumf %5, %6 : vector<16x256xf32>
    %c0_6 = arith.constant 0 : index
    %c0_7 = arith.constant 0 : index
    %8 = vector.load %arg4[%c0_6, %c0_7] : memref<256x256xf32, #tpu.memory_space<vmem>>, vector<256x256xf32>
    %cst_8 = arith.constant dense<0.000000e+00> : vector<16x256xf32>
    %9 = tpu.matmul %7, %8, %cst_8 {dimension_numbers = #tpu.dot_dimension_numbers<[1], [0], [0], [1], [0, 0, 1, 1], [], []>} : vector<16x256xf32>, vector<256x256xf32>, vector<16x256xf32> -> vector<16x256xf32>
    %c0_9 = arith.constant 0 : index
    %c0_10 = arith.constant 0 : index
    %10 = vector.load %arg5[%c0_9, %c0_10] : memref<1x256xf32, #tpu.memory_space<vmem>>, vector<1x256xf32>
    %11 = vector.broadcast %10 : vector<1x256xf32> to vector<16x256xf32>
    %12 = arith.addf %9, %11 : vector<16x256xf32>
    %c0_11 = arith.constant 0 : index
    %c0_12 = arith.constant 0 : index
    %13 = vector.load %arg6[%c0_11, %c0_12] : memref<16x256xf32, #tpu.memory_space<vmem>>, vector<16x256xf32>
    tpu.vector_store %arg6[%c0_11, %c0_12], %12 {strides = array<i32>} : memref<16x256xf32, #tpu.memory_space<vmem>>, vector<16x256xf32>,
    return
  }
  func.func @transform_0(%arg0: i32) -> (i32, i32) {
    %c0_i32 = arith.constant 0 : i32
    %c0_i32_0 = arith.constant 0 : i32
    return %arg0, %c0_i32 : i32, i32
  }
  func.func @transform_1(%arg0: i32) -> (i32, i32) {
    %c0_i32 = arith.constant 0 : i32
    %c0_i32_0 = arith.constant 0 : i32
    %c0_i32_1 = arith.constant 0 : i32
    return %c0_i32, %c0_i32_0 : i32, i32
  }
  func.func @transform_2(%arg0: i32) -> (i32, i32) {
    %c0_i32 = arith.constant 0 : i32
    %c0_i32_0 = arith.constant 0 : i32
    %c0_i32_1 = arith.constant 0 : i32
    return %c0_i32, %c0_i32_0 : i32, i32
  }
  func.func @transform_3(%arg0: i32) -> (i32, i32) {
    %c0_i32 = arith.constant 0 : i32
    %c0_i32_0 = arith.constant 0 : i32
    %c0_i32_1 = arith.constant 0 : i32
    return %c0_i32, %c0_i32_0 : i32, i32
  }
  func.func @transform_4(%arg0: i32) -> (i32, i32) {
    %c0_i32 = arith.constant 0 : i32
    %c0_i32_0 = arith.constant 0 : i32
    %c0_i32_1 = arith.constant 0 : i32
    return %c0_i32, %c0_i32_0 : i32, i32
  }
  func.func @transform_5(%arg0: i32) -> (i32, i32) {
    %c0_i32 = arith.constant 0 : i32
    %c0_i32_0 = arith.constant 0 : i32
    return %arg0, %c0_i32 : i32, i32
  }
}

</mosaic_0001>

<bundles_post_ra>
// kernel: tpu_custom_call.1
= control target key start
LH: loop header
LB: loop body
LE: loop exit
PB: predicated region body
PF: predicated region fallthrough
CT: control target
= control target key end

     0   :  { %10 = vsyncpa [#allocation3], 0  ;;  %s641_s0 = inlined_call_operand.hbm [shape: f32[16,256], index: 0, kind: input, shape index: {}]   ;;  %s642_s1 = inlined_call_operand.hbm [shape: f32[256,256], index: 1, kind: input, shape index: {}]   ;;  %s643_s2 = inlined_call_operand.hbm [shape: f32[1,256], index: 2, kind: input, shape index: {}]   ;;  %s644_s3 = inlined_call_operand.hbm [shape: f32[256,256], index: 3, kind: input, shape index: {}]   ;;  %s645_s4 = inlined_call_operand.vmem [shape: f32[1,256], index: 4, kind: input, shape index: {}]   ;;  %s646_s5 = inlined_call_operand.hbm [shape: f32[16,256], index: 5, kind: output, shape index: {}]  }
   0x1   :  { %11 = vsyncpa [#allocation6], 0 }
   0x2   :  { %12 = vsyncpa [#allocation9], 0 }
   0x3   :  { %13 = vsyncpa [#allocation4], 0  ;;  %s31_s20 = sshll.u32 %s642_s1, 4  ;;  %s574_s21 = smov [#allocation5]   ;;  %s32_s20 = int_to_ptr.hbm [resolvable:$true] %s31_s20 }
   0x4   :  { %s33_s22 = sshll.u32 %s574_s21, 4  ;;  %s18_s25 = sshll.u32 %s641_s0, 4  ;;  %s34_s22 = int_to_ptr.vmem [resolvable:$true] %s33_s22  ;;  %s19_s25 = int_to_ptr.hbm [resolvable:$true] %s18_s25 }
   0x5   :  { %s575_s26 = smov 256   ;;  %s576_s27 = smov 16  }
   0x6   :  { %39 = dma.hbm_to_vmem [thread:$0]  %s32_s20, 8192, %s34_s22, [#allocation6], %s575_s26, %s575_s26, %s576_s27  }
   0x7   :  { %s577_s28 = smov [#allocation2]   ;;  %s45_s1 = sshll.u32 %s643_s2, 4  ;;  %s46_s1 = int_to_ptr.hbm [resolvable:$true] %s45_s1 }
   0x8   :  { %s20_s29 = sshll.u32 %s577_s28, 4  ;;  %s55_s8 = sshll.u32 %s644_s3, 4  ;;  %s21_s29 = int_to_ptr.vmem [resolvable:$true] %s20_s29  ;;  %s56_s8 = int_to_ptr.hbm [resolvable:$true] %s55_s8 }
   0x9   :  { %26 = dma.hbm_to_vmem [thread:$0]  %s19_s25, 512, %s21_s29, [#allocation3], %s575_s26, %s575_s26, %s576_s27  }
   0xa   :  { %s578_s9 = smov [#allocation7]   ;;  %s579_s11 = smov [#allocation8]  }
   0xb   :  { %s47_s10 = sshll.u32 %s578_s9, 4  ;;  %s57_s12 = sshll.u32 %s579_s11, 4  ;;  %s48_s10 = int_to_ptr.vmem [resolvable:$true] %s47_s10  ;;  %s58_s12 = int_to_ptr.vmem [resolvable:$true] %s57_s12 }
   0xc   :  { %50 = dma.hbm_to_vmem [thread:$0]  %s46_s1, 32, %s48_s10, [#allocation6]  }
   0xd   :  { %63 = dma.hbm_to_vmem [thread:$0]  %s56_s8, 8192, %s58_s12, [#allocation9], %s575_s26, %s575_s26, %s576_s27  }
   0xe   :  { %566 = dma.done.wait [#allocation3], 512  }
   0xf   :  { %567 = vsyncadd [#allocation3], 4294966784 }
  0x10   :  { %568 = dma.done.wait [#allocation6], 8224  }
  0x11   :  { %569 = vsyncadd [#allocation6], 4294959072 }
  0x12   :  { %570 = dma.done.wait [#allocation9], 8192  }
  0x13   :  { %571 = vsyncadd [#allocation9], 4294959104  ;;  %v117_v0 = vld [vmem:[#allocation5 + $0xf8] sm:$0xff]  ;;  %v115_v1 = vld [vmem:[#allocation5 + $0xe8] sm:$0xff]  ;;  %s424_s16 = sshll.u32 %s646_s5, 4  ;;  %s425_s16 = int_to_ptr.hbm [resolvable:$true] %s424_s16 }
  0x14   :  { %v149_v2 = vld [vmem:[#allocation5 + $0x1f8] sm:$0xff]  ;;  %202 = vmatpush.msra.mxu2 %v117_v0  ;;  %v116_v3 = vld [vmem:[#allocation5 + $0xf0] sm:$0xff]  ;;  %v147_v4 = vld [vmem:[#allocation5 + $0x1e8] sm:$0xff] }
  0x15   :  { %225 = vmatpush.msra.mxu3 %v149_v2  ;;  %156 = vmatpush.msra.mxu0 %v116_v3  ;;  %v113_v5 = vld [vmem:[#allocation5 + $0xd8] sm:$0xff]  ;;  %v114_v6 = vld [vmem:[#allocation5 + $0xe0] sm:$0xff]  ;;  %v148_v7 = vld [vmem:[#allocation5 + $0x1f0] sm:$0xff] }
  0x16   :  { %203 = vmatpush.msra.mxu2 %v115_v1  ;;  %v145_v8 = vld [vmem:[#allocation5 + $0x1d8] sm:$0xff]  ;;  %v112_v9 = vld [vmem:[#allocation5 + $0xd0] sm:$0xff]  ;;  %v146_v10 = vld [vmem:[#allocation5 + $0x1e0] sm:$0xff]  ;;  %179 = vmatpush.msra.mxu1 %v148_v7 }
  0x17   :  { %226 = vmatpush.msra.mxu3 %v147_v4  ;;  %157 = vmatpush.msra.mxu0 %v114_v6  ;;  %v111_v11 = vld [vmem:[#allocation5 + $0xc8] sm:$0xff]  ;;  %v110_v13 = vld [vmem:[#allocation5 + $0xc0] sm:$0xff]  ;;  %v144_v14 = vld [vmem:[#allocation5 + $0x1d0] sm:$0xff] }
  0x18   :  { %v143_v12 = vld [vmem:[#allocation5 + $0x1c8] sm:$0xff]  ;;  %204 = vmatpush.msra.mxu2 %v113_v5  ;;  %180 = vmatpush.msra.mxu1 %v146_v10  ;;  %v109_v15 = vld [vmem:[#allocation5 + $0xb8] sm:$0xff]  ;;  %v108_v17 = vld [vmem:[#allocation5 + $0xb0] sm:$0xff] }
  0x19   :  { %227 = vmatpush.msra.mxu3 %v145_v8  ;;  %158 = vmatpush.msra.mxu0 %v112_v9  ;;  %v141_v16 = vld [vmem:[#allocation5 + $0x1b8] sm:$0xff]  ;;  %v142_v18 = vld [vmem:[#allocation5 + $0x1c0] sm:$0xff]  ;;  %v107_v19 = vld [vmem:[#allocation5 + $0xa8] sm:$0xff] }
  0x1a   :  { %205 = vmatpush.msra.mxu2 %v111_v11  ;;  %181 = vmatpush.msra.mxu1 %v144_v14  ;;  %v139_v20 = vld [vmem:[#allocation5 + $0x1a8] sm:$0xff]  ;;  %v106_v21 = vld [vmem:[#allocation5 + $0xa0] sm:$0xff]  ;;  %v140_v22 = vld [vmem:[#allocation5 + $0x1b0] sm:$0xff] }
  0x1b   :  { %228 = vmatpush.msra.mxu3 %v143_v12  ;;  %159 = vmatpush.msra.mxu0 %v110_v13  ;;  %v105_v23 = vld [vmem:[#allocation5 + $0x98] sm:$0xff]  ;;  %v104_v25 = vld [vmem:[#allocation5 + $0x90] sm:$0xff]  ;;  %v138_v26 = vld [vmem:[#allocation5 + $0x1a0] sm:$0xff] }
  0x1c   :  { %206 = vmatpush.msra.mxu2 %v109_v15  ;;  %182 = vmatpush.msra.mxu1 %v142_v18  ;;  %v137_v24 = vld [vmem:[#allocation5 + $0x198] sm:$0xff]  ;;  %v103_v27 = vld [vmem:[#allocation5 + $0x88] sm:$0xff]  ;;  %v102_v29 = vld [vmem:[#allocation5 + $0x80] sm:$0xff] }
  0x1d   :  { %229 = vmatpush.msra.mxu3 %v141_v16  ;;  %160 = vmatpush.msra.mxu0 %v108_v17  ;;  %v135_v28 = vld [vmem:[#allocation5 + $0x188] sm:$0xff]  ;;  %v136_v30 = vld [vmem:[#allocation5 + $0x190] sm:$0xff]  ;;  %v101_v31 = vld [vmem:[#allocation5 + $0x78] sm:$0xff] }
  0x1e   :  { %207 = vmatpush.msra.mxu2 %v107_v19  ;;  %183 = vmatpush.msra.mxu1 %v140_v22  ;;  %v133_v32 = vld [vmem:[#allocation5 + $0x178] sm:$0xff]  ;;  %v100_v33 = vld [vmem:[#allocation5 + $0x70] sm:$0xff]  ;;  %v134_v34 = vld [vmem:[#allocation5 + $0x180] sm:$0xff] }
  0x1f   :  { %230 = vmatpush.msra.mxu3 %v139_v20  ;;  %161 = vmatpush.msra.mxu0 %v106_v21  ;;  %v99_v35 = vld [vmem:[#allocation5 + $0x68] sm:$0xff]  ;;  %v98_v37 = vld [vmem:[#allocation5 + $0x60] sm:$0xff]  ;;  %v132_v38 = vld [vmem:[#allocation5 + $0x170] sm:$0xff] }
  0x20   :  { %208 = vmatpush.msra.mxu2 %v105_v23  ;;  %184 = vmatpush.msra.mxu1 %v138_v26  ;;  %v131_v36 = vld [vmem:[#allocation5 + $0x168] sm:$0xff]  ;;  %v97_v39 = vld [vmem:[#allocation5 + $0x58] sm:$0xff]  ;;  %v96_v41 = vld [vmem:[#allocation5 + $0x50] sm:$0xff] }
  0x21   :  { %231 = vmatpush.msra.mxu3 %v137_v24  ;;  %162 = vmatpush.msra.mxu0 %v104_v25  ;;  %v129_v40 = vld [vmem:[#allocation5 + $0x158] sm:$0xff]  ;;  %v130_v42 = vld [vmem:[#allocation5 + $0x160] sm:$0xff]  ;;  %v95_v43 = vld [vmem:[#allocation5 + $0x48] sm:$0xff] }
  0x22   :  { %209 = vmatpush.msra.mxu2 %v103_v27  ;;  %185 = vmatpush.msra.mxu1 %v136_v30  ;;  %v127_v44 = vld [vmem:[#allocation5 + $0x148] sm:$0xff]  ;;  %v94_v45 = vld [vmem:[#allocation5 + $0x40] sm:$0xff]  ;;  %v128_v46 = vld [vmem:[#allocation5 + $0x150] sm:$0xff] }
  0x23   :  { %232 = vmatpush.msra.mxu3 %v135_v28  ;;  %163 = vmatpush.msra.mxu0 %v102_v29  ;;  %v93_v47 = vld [vmem:[#allocation5 + $0x38] sm:$0xff]  ;;  %v92_v49 = vld [vmem:[#allocation5 + $0x30] sm:$0xff]  ;;  %v126_v50 = vld [vmem:[#allocation5 + $0x140] sm:$0xff] }
  0x24   :  { %210 = vmatpush.msra.mxu2 %v101_v31  ;;  %186 = vmatpush.msra.mxu1 %v134_v34  ;;  %v125_v48 = vld [vmem:[#allocation5 + $0x138] sm:$0xff]  ;;  %v91_v51 = vld [vmem:[#allocation5 + $0x28] sm:$0xff]  ;;  %v90_v53 = vld [vmem:[#allocation5 + $0x20] sm:$0xff] }
  0x25   :  { %233 = vmatpush.msra.mxu3 %v133_v32  ;;  %164 = vmatpush.msra.mxu0 %v100_v33  ;;  %v123_v52 = vld [vmem:[#allocation5 + $0x128] sm:$0xff]  ;;  %v124_v54 = vld [vmem:[#allocation5 + $0x130] sm:$0xff]  ;;  %v89_v55 = vld [vmem:[#allocation5 + $0x18] sm:$0xff] }
  0x26   :  { %211 = vmatpush.msra.mxu2 %v99_v35  ;;  %187 = vmatpush.msra.mxu1 %v132_v38  ;;  %v121_v56 = vld [vmem:[#allocation5 + $0x118] sm:$0xff]  ;;  %v88_v57 = vld [vmem:[#allocation5 + $0x10] sm:$0xff]  ;;  %v122_v58 = vld [vmem:[#allocation5 + $0x120] sm:$0xff] }
  0x27   :  { %234 = vmatpush.msra.mxu3 %v131_v36  ;;  %165 = vmatpush.msra.mxu0 %v98_v37  ;;  %v87_v59 = vld [vmem:[#allocation5 + $0x8] sm:$0xff]  ;;  %v82_v61 = vld [vmem:[#allocation2] sm:$0xff]  ;;  %v120_v0 = vld [vmem:[#allocation5 + $0x110] sm:$0xff] }
  0x28   :  { %212 = vmatpush.msra.mxu2 %v97_v39  ;;  %188 = vmatpush.msra.mxu1 %v130_v42  ;;  %v119_v60 = vld [vmem:[#allocation5 + $0x108] sm:$0xff]  ;;  %v86_v63 = vld [vmem:[#allocation5] sm:$0xff]  ;;  %v282_v3 = vld [vmem:[#allocation8 + $0xf0] sm:$0xff] }
  0x29   :  { %235 = vmatpush.msra.mxu3 %v129_v40  ;;  %166 = vmatpush.msra.mxu0 %v96_v41  ;;  %v83_v62 = vld [vmem:[#allocation2 + $0x8] sm:$0xff]  ;;  %v283_v1 = vld [vmem:[#allocation8 + $0xf8] sm:$0xff]  ;;  %v314_v6 = vld [vmem:[#allocation8 + $0x1f0] sm:$0xff] }
  0x2a   :  { %213 = vmatpush.msra.mxu2 %v95_v43  ;;  %189 = vmatpush.msra.mxu1 %v128_v46  ;;  %v118_v2 = vld [vmem:[#allocation5 + $0x100] sm:$0xff]  ;;  %v281_v4 = vld [vmem:[#allocation8 + $0xe8] sm:$0xff]  ;;  %v278_v9 = vld [vmem:[#allocation8 + $0xd0] sm:$0xff] }
  0x2b   :  { %236 = vmatpush.msra.mxu3 %v127_v44  ;;  %167 = vmatpush.msra.mxu0 %v94_v45  ;;  %v280_v5 = vld [vmem:[#allocation8 + $0xe0] sm:$0xff]  ;;  %v315_v7 = vld [vmem:[#allocation8 + $0x1f8] sm:$0xff]  ;;  %v84_v11 = vld [vmem:[#allocation2 + $0x10] sm:$0xff] }
  0x2c   :  { %214 = vmatpush.msra.mxu2 %v93_v47  ;;  %190 = vmatpush.msra.mxu1 %v126_v50  ;;  %v279_v8 = vld [vmem:[#allocation8 + $0xd8] sm:$0xff]  ;;  %v312_v10 = vld [vmem:[#allocation8 + $0x1e0] sm:$0xff]  ;;  %v313_v13 = vld [vmem:[#allocation8 + $0x1e8] sm:$0xff] }
  0x2d   :  { %237 = vmatpush.msra.mxu3 %v125_v48  ;;  %168 = vmatpush.msra.mxu0 %v92_v49  ;;  %v85_v12 = vld [vmem:[#allocation2 + $0x18] sm:$0xff]  ;;  %v276_v14 = vld [vmem:[#allocation8 + $0xc0] sm:$0xff]  ;;  %v277_v16 = vld [vmem:[#allocation8 + $0xc8] sm:$0xff] }
  0x2e   :  { %215 = vmatpush.msra.mxu2 %v91_v51  ;;  %191 = vmatpush.msra.mxu1 %v124_v54  ;;  %v310_v15 = vld [vmem:[#allocation8 + $0x1d0] sm:$0xff]  ;;  %v311_v17 = vld [vmem:[#allocation8 + $0x1d8] sm:$0xff]  ;;  %v308_v19 = vld [vmem:[#allocation8 + $0x1c0] sm:$0xff] }
  0x2f   :  { %238 = vmatpush.msra.mxu3 %v123_v52  ;;  %169 = vmatpush.msra.mxu0 %v90_v53  ;;  %v274_v18 = vld [vmem:[#allocation8 + $0xb0] sm:$0xff]  ;;  %v275_v20 = vld [vmem:[#allocation8 + $0xb8] sm:$0xff]  ;;  %v309_v21 = vld [vmem:[#allocation8 + $0x1c8] sm:$0xff] }
  0x30   :  { %216 = vmatpush.msra.mxu2 %v89_v55  ;;  %192 = vmatpush.msra.mxu1 %v122_v58  ;;  %v272_v22 = vld [vmem:[#allocation8 + $0xa0] sm:$0xff]  ;;  %v306_v23 = vld [vmem:[#allocation8 + $0x1b0] sm:$0xff]  ;;  %v273_v24 = vld [vmem:[#allocation8 + $0xa8] sm:$0xff] }
  0x31   :  { %239 = vmatpush.msra.mxu3 %v121_v56  ;;  %170 = vmatpush.msra.mxu0 %v88_v57  ;;  %v307_v25 = vld [vmem:[#allocation8 + $0x1b8] sm:$0xff]  ;;  %v270_v26 = vld [vmem:[#allocation8 + $0x90] sm:$0xff]  ;;  %v304_v27 = vld [vmem:[#allocation8 + $0x1a0] sm:$0xff] }
  0x32   :  { %217 = vmatpush.msra.mxu2 %v87_v59  ;;  %193 = vmatpush.msra.mxu1 %v120_v0  ;;  %v271_v28 = vld [vmem:[#allocation8 + $0x98] sm:$0xff]  ;;  %v305_v29 = vld [vmem:[#allocation8 + $0x1a8] sm:$0xff]  ;;  %v268_v30 = vld [vmem:[#allocation8 + $0x80] sm:$0xff] }
  0x33   :  { %240 = vmatpush.msra.mxu3 %v119_v60  ;;  %218 = vmatmul.f32.vlgmr.msra.gmra.mxu2 %v82_v61  ;;  %v302_v31 = vld [vmem:[#allocation8 + $0x190] sm:$0xff]  ;;  %v269_v32 = vld [vmem:[#allocation8 + $0x88] sm:$0xff]  ;;  %v303_v33 = vld [vmem:[#allocation8 + $0x198] sm:$0xff] }
  0x34   :  { %241 = vmatmul.f32.vlgmr.msra.gmra.mxu3 %v83_v62  ;;  %171 = vmatpush.msra.mxu0 %v86_v63  ;;  %v266_v34 = vld [vmem:[#allocation8 + $0x70] sm:$0xff]  ;;  %v300_v35 = vld [vmem:[#allocation8 + $0x180] sm:$0xff]  ;;  %v267_v36 = vld [vmem:[#allocation8 + $0x78] sm:$0xff] }
  0x35   :  { %172 = vmatmul.f32.vlgmr.msra.gmra.mxu0 %v82_v61  ;;  %368 = vmatpush.msrb.mxu2 %v283_v1  ;;  %v301_v37 = vld [vmem:[#allocation8 + $0x188] sm:$0xff]  ;;  %v264_v38 = vld [vmem:[#allocation8 + $0x60] sm:$0xff]  ;;  %v298_v39 = vld [vmem:[#allocation8 + $0x170] sm:$0xff] }
  0x36   :  { %194 = vmatpush.msra.mxu1 %v118_v2  ;;  %322 = vmatpush.msrb.mxu0 %v282_v3  ;;  %v265_v40 = vld [vmem:[#allocation8 + $0x68] sm:$0xff]  ;;  %v299_v41 = vld [vmem:[#allocation8 + $0x178] sm:$0xff]  ;;  %v262_v42 = vld [vmem:[#allocation8 + $0x50] sm:$0xff] }
  0x37   :  { %195 = vmatmul.f32.vlgmr.msra.gmra.mxu1 %v83_v62  ;;  %369 = vmatpush.msrb.mxu2 %v281_v4  ;;  %v296_v43 = vld [vmem:[#allocation8 + $0x160] sm:$0xff]  ;;  %v263_v44 = vld [vmem:[#allocation8 + $0x58] sm:$0xff]  ;;  %v297_v45 = vld [vmem:[#allocation8 + $0x168] sm:$0xff] }
  0x38   :  { %323 = vmatpush.msrb.mxu0 %v280_v5  ;;  %345 = vmatpush.msrb.mxu1 %v314_v6  ;;  %v260_v46 = vld [vmem:[#allocation8 + $0x40] sm:$0xff]  ;;  %v294_v47 = vld [vmem:[#allocation8 + $0x150] sm:$0xff]  ;;  %v261_v48 = vld [vmem:[#allocation8 + $0x48] sm:$0xff] }
  0x39   :  { %391 = vmatpush.msrb.mxu3 %v315_v7  ;;  %370 = vmatpush.msrb.mxu2 %v279_v8  ;;  %v295_v49 = vld [vmem:[#allocation8 + $0x158] sm:$0xff]  ;;  %v258_v50 = vld [vmem:[#allocation8 + $0x30] sm:$0xff]  ;;  %v292_v51 = vld [vmem:[#allocation8 + $0x140] sm:$0xff] }
  0x3a   :  { %324 = vmatpush.msrb.mxu0 %v278_v9  ;;  %346 = vmatpush.msrb.mxu1 %v312_v10  ;;  %v259_v52 = vld [vmem:[#allocation8 + $0x38] sm:$0xff]  ;;  %v293_v53 = vld [vmem:[#allocation8 + $0x148] sm:$0xff]  ;;  %v256_v54 = vld [vmem:[#allocation8 + $0x20] sm:$0xff] }
  0x3b   :  { %221 = vmatmul.f32.gmra.mxu2 %v84_v11  ;;  %392 = vmatpush.msrb.mxu3 %v313_v13  ;;  %v290_v55 = vld [vmem:[#allocation8 + $0x130] sm:$0xff]  ;;  %v257_v56 = vld [vmem:[#allocation8 + $0x28] sm:$0xff]  ;;  %v291_v57 = vld [vmem:[#allocation8 + $0x138] sm:$0xff] }
  0x3c   :  { %244 = vmatmul.f32.gmra.mxu3 %v85_v12  ;;  %325 = vmatpush.msrb.mxu0 %v276_v14  ;;  %v254_v58 = vld [vmem:[#allocation8 + $0x10] sm:$0xff]  ;;  %v288_v59 = vld [vmem:[#allocation8 + $0x120] sm:$0xff]  ;;  %v255_v60 = vld [vmem:[#allocation8 + $0x18] sm:$0xff] }
  0x3d   :  { %175 = vmatmul.f32.gmra.mxu0 %v84_v11  ;;  %347 = vmatpush.msrb.mxu1 %v310_v15  ;;  %v289_v61 = vld [vmem:[#allocation8 + $0x128] sm:$0xff]  ;;  %v252_v62 = vld [vmem:[#allocation8] sm:$0xff]  ;;  %v286_v63 = vld [vmem:[#allocation8 + $0x110] sm:$0xff] }
  0x3e   :  { %371 = vmatpush.msrb.mxu2 %v277_v16  ;;  %393 = vmatpush.msrb.mxu3 %v311_v17  ;;  %v253_v0 = vld [vmem:[#allocation8 + $0x8] sm:$0xff]  ;;  %v287_v1 = vld [vmem:[#allocation8 + $0x118] sm:$0xff]  ;;  %v284_v2 = vld [vmem:[#allocation8 + $0x100] sm:$0xff] }
  0x3f   :  { %198 = vmatmul.f32.gmra.mxu1 %v85_v12  ;;  %326 = vmatpush.msrb.mxu0 %v274_v18  ;;  %v285_v3 = vld [vmem:[#allocation8 + $0x108] sm:$0xff]  ;;  %v150_v4 = vld [vmem:[#allocation7] sm:$0x3] }
  0x40   :  { %348 = vmatpush.msrb.mxu1 %v308_v19  ;;  %372 = vmatpush.msrb.mxu2 %v275_v20  ;;  %v152_v5 = vperm.slane %v150_v4, 0  ;;  %v153_v8 = vperm.slane %v150_v4, 1 }
  0x41   :  { %394 = vmatpush.msrb.mxu3 %v309_v21  ;;  %327 = vmatpush.msrb.mxu0 %v272_v22 }
  0x42   :  { %349 = vmatpush.msrb.mxu1 %v306_v23  ;;  %373 = vmatpush.msrb.mxu2 %v273_v24 }
  0x43   :  { %395 = vmatpush.msrb.mxu3 %v307_v25  ;;  %328 = vmatpush.msrb.mxu0 %v270_v26 }
  0x44   :  { %350 = vmatpush.msrb.mxu1 %v304_v27  ;;  %374 = vmatpush.msrb.mxu2 %v271_v28  ;;  %v316_v27 = vld [vmem:[%s645_s4] sm:$0x3]  ;;  %s580_s4 = smov [#allocation10]  }
  0x45   :  { %396 = vmatpush.msrb.mxu3 %v305_v29  ;;  %329 = vmatpush.msrb.mxu0 %v268_v30  ;;  %v318_v28 = vperm.slane %v316_v27, 0  ;;  %s422_s13 = sshll.u32 %s580_s4, 4  ;;  %s423_s13 = int_to_ptr.vmem [resolvable:$true] %s422_s13 }
  0x46   :  { %351 = vmatpush.msrb.mxu1 %v302_v31  ;;  %375 = vmatpush.msrb.mxu2 %v269_v32  ;;  %v319_v31 = vperm.slane %v316_v27, 1 }
  0x47   :  { %397 = vmatpush.msrb.mxu3 %v303_v33  ;;  %330 = vmatpush.msrb.mxu0 %v266_v34 }
  0x48   :  { %352 = vmatpush.msrb.mxu1 %v300_v35  ;;  %376 = vmatpush.msrb.mxu2 %v267_v36 }
  0x49   :  { %398 = vmatpush.msrb.mxu3 %v301_v37  ;;  %331 = vmatpush.msrb.mxu0 %v264_v38 }
  0x4a   :  { %353 = vmatpush.msrb.mxu1 %v298_v39  ;;  %377 = vmatpush.msrb.mxu2 %v265_v40 }
  0x4b   :  { %399 = vmatpush.msrb.mxu3 %v299_v41  ;;  %332 = vmatpush.msrb.mxu0 %v262_v42 }
  0x4c   :  { %354 = vmatpush.msrb.mxu1 %v296_v43  ;;  %378 = vmatpush.msrb.mxu2 %v263_v44 }
  0x4d   :  { %400 = vmatpush.msrb.mxu3 %v297_v45  ;;  %333 = vmatpush.msrb.mxu0 %v260_v46 }
  0x4e   :  { %355 = vmatpush.msrb.mxu1 %v294_v47  ;;  %379 = vmatpush.msrb.mxu2 %v261_v48 }
  0x4f   :  { %401 = vmatpush.msrb.mxu3 %v295_v49  ;;  %334 = vmatpush.msrb.mxu0 %v258_v50 }
  0x50   :  { %356 = vmatpush.msrb.mxu1 %v292_v51  ;;  %380 = vmatpush.msrb.mxu2 %v259_v52 }
  0x51   :  { %402 = vmatpush.msrb.mxu3 %v293_v53  ;;  %335 = vmatpush.msrb.mxu0 %v256_v54 }
  0x52   :  { %357 = vmatpush.msrb.mxu1 %v290_v55  ;;  %381 = vmatpush.msrb.mxu2 %v257_v56 }
  0x53   :  { %403 = vmatpush.msrb.mxu3 %v291_v57  ;;  %336 = vmatpush.msrb.mxu0 %v254_v58 }
  0x54   :  { %358 = vmatpush.msrb.mxu1 %v288_v59  ;;  %382 = vmatpush.msrb.mxu2 %v255_v60 }
  0x55   :  { %404 = vmatpush.msrb.mxu3 %v289_v61  ;;  %337 = vmatpush.msrb.mxu0 %v252_v62 }
  0x56   :  { %359 = vmatpush.msrb.mxu1 %v286_v63  ;;  %383 = vmatpush.msrb.mxu2 %v253_v0 }
  0x57   :  { %405 = vmatpush.msrb.mxu3 %v287_v1 }
  0x58   :  { %360 = vmatpush.msrb.mxu1 %v284_v2 }
  0x59   :  { %406 = vmatpush.msrb.mxu3 %v285_v3 }
  0xb2   :  { %v173_v6 = vpop.f32.mrf.mxu0 }
  0xb3   :  { %v174_v7 = vadd.f32 %v173_v6, %v152_v5 }
  0xb4   :  { %v196_v9 = vpop.f32.mrf.mxu1 }
  0xb5   :  { %v197_v10 = vadd.f32 %v196_v9, %v174_v7 }
  0xb6   :  { %v219_v11 = vpop.f32.mrf.mxu2 }
  0xb7   :  { %v242_v12 = vpop.f32.mrf.mxu3  ;;  %v248_v13 = vmax.f32 %v197_v10, 0.0  ;;  %v220_v14 = vadd.f32 %v219_v11, %v153_v8 }
  0xb9   :  { %v243_v15 = vadd.f32 %v242_v12, %v220_v14  ;;  %338 = vmatmul.f32.vlgmr.msrb.gmra.mxu0 %v248_v13  ;;  %384 = vmatmul.f32.vlgmr.msrb.gmra.mxu2 %v248_v13 }
  0xba   :  { %v176_v16 = vpop.f32.mrf.mxu0 }
  0xbb   :  { %v249_v17 = vmax.f32 %v243_v15, 0.0  ;;  %v177_v18 = vadd.f32 %v176_v16, %v152_v5 }
  0xbc   :  { %v199_v19 = vpop.f32.mrf.mxu1 }
  0xbd   :  { %361 = vmatmul.f32.vlgmr.msrb.gmra.mxu1 %v249_v17  ;;  %407 = vmatmul.f32.vlgmr.msrb.gmra.mxu3 %v249_v17  ;;  %v200_v20 = vadd.f32 %v199_v19, %v177_v18 }
  0xbe   :  { %v222_v21 = vpop.f32.mrf.mxu2 }
  0xbf   :  { %v245_v22 = vpop.f32.mrf.mxu3  ;;  %v250_v23 = vmax.f32 %v200_v20, 0.0  ;;  %v223_v24 = vadd.f32 %v222_v21, %v153_v8 }
  0xc1   :  { %v246_v25 = vadd.f32 %v245_v22, %v223_v24  ;;  %341 = vmatmul.f32.gmra.mxu0 %v250_v23  ;;  %387 = vmatmul.f32.gmra.mxu2 %v250_v23 }
  0xc3   :  { %v251_v26 = vmax.f32 %v246_v25, 0.0 }
  0xc5   :  { %364 = vmatmul.f32.gmra.mxu1 %v251_v26  ;;  %410 = vmatmul.f32.gmra.mxu3 %v251_v26 }
 0x136   :  { %v339_v29 = vpop.f32.mrf.mxu0 }
 0x137   :  { %v340_v30 = vadd.f32 %v339_v29, %v318_v28 }
 0x13a   :  { %v362_v32 = vpop.f32.mrf.mxu1 }
 0x13b   :  { %v363_v33 = vadd.f32 %v362_v32, %v340_v30 }
 0x13c   :  { %v385_v34 = vpop.f32.mrf.mxu2 }
 0x13d   :  { %414 = vst [vmem:[#allocation10] sm:$0xff] %v363_v33  ;;  %v386_v35 = vadd.f32 %v385_v34, %v319_v31 }
 0x13e   :  { %v342_v36 = vpop.f32.mrf.mxu0 }
 0x13f   :  { %v343_v37 = vadd.f32 %v342_v36, %v318_v28 }
 0x140   :  { %v408_v38 = vpop.f32.mrf.mxu3 }
 0x141   :  { %v409_v39 = vadd.f32 %v408_v38, %v386_v35 }
 0x142   :  { %v365_v40 = vpop.f32.mrf.mxu1 }
 0x143   :  { %415 = vst [vmem:[#allocation10 + $0x8] sm:$0xff] %v409_v39  ;;  %v366_v41 = vadd.f32 %v365_v40, %v343_v37 }
 0x144   :  { %v388_v42 = vpop.f32.mrf.mxu2 }
 0x145   :  { %416 = vst [vmem:[#allocation10 + $0x10] sm:$0xff] %v366_v41  ;;  %v389_v43 = vadd.f32 %v388_v42, %v319_v31 }
 0x148   :  { %v411_v44 = vpop.f32.mrf.mxu3 }
 0x149   :  { %v412_v45 = vadd.f32 %v411_v44, %v389_v43 }
 0x14b   :  { %417 = vst [vmem:[#allocation10 + $0x18] sm:$0xff] %v412_v45 }
 0x14c   :  { %430 = dma.vmem_to_hbm [thread:$0]  %s423_s13, 512, %s425_s16, [#allocation4], %s575_s26, %s575_s26, %s576_s27  }
 0x14d   :  { %572 = dma.done.wait [#allocation4], 512  }
 0x14e   :  { %573 = vsyncadd [#allocation4], 4294966784 }
 0x14f   :  { %435 = vsyncpa [#allocation3], 1 }
 0x150   :  { %436 = vsyncpa [#allocation6], 1 }
 0x151   :  { %437 = vsyncpa [#allocation9], 1 }
 0x152   :  { %438 = vsyncpa [#allocation4], 1 }

</bundles_post_ra>
